<compile_context>
chip_gen: v5e
topology: v5e:2x2
jax: 0.10.0
libtpu: 0.0.40
codegen_flags: <defaults>
</compile_context>

<pallas_src>
import math

import jax
import jax.numpy as jnp
from jax.experimental import pallas as pl
from jax.experimental.pallas import tpu as pltpu


def _patch_merging_kernel(x_ref, we_ref, wo_ref, wsum_ref, b_ref, o_ref):
    """One grid step: tr merged image rows -> tr*W2 output patches.

    x_ref:    (tr, 2, W2, 2C)  parity 0 = even image rows (channels [x0 | x2]),
                               parity 1 = odd  image rows (channels [x1 | x3])
    we_ref:   (2C, Co)  gamma-folded reduction weight rows for [x0; x2]
    wo_ref:   (2C, Co)  gamma-folded reduction weight rows for [x1; x3]
    wsum_ref: (1, Co)   column sums of (We + Wo), f32 (mean fold)
    b_ref:    (1, Co)   beta @ W^T (LN bias folded through the linear), f32
    o_ref:    (tr*W2, Co)
    """
    tr, _, w2, c2 = x_ref.shape
    tm = tr * w2

    # Static-parity views; collapsing (tr, W2) is a free relabel when
    # W2 % 8 == 0 (Mosaic inserts a relayout otherwise -- still correct).
    xe = x_ref[:, 0].reshape(tm, c2)
    xo = x_ref[:, 1].reshape(tm, c2)

    # LayerNorm statistics over the full 4C vector, one pass, f32 accumulation.
    xef = xe.astype(jnp.float32)
    xof = xo.astype(jnp.float32)
    inv_n = 1.0 / (2.0 * c2)  # == 1 / (4*C)
    mean = (jnp.sum(xef, axis=-1, keepdims=True)
            + jnp.sum(xof, axis=-1, keepdims=True)) * inv_n
    ex2 = (jnp.sum(xef * xef, axis=-1, keepdims=True)
           + jnp.sum(xof * xof, axis=-1, keepdims=True)) * inv_n
    var = jnp.maximum(ex2 - mean * mean, 0.0)
    rstd = jax.lax.rsqrt(var + 1e-5)

    # Raw activations straight into the MXU; mean subtraction folded into the
    # (smaller) output tile via the precomputed weight column sums.
    acc = jnp.dot(xe, we_ref[...], preferred_element_type=jnp.float32)
    acc = acc + jnp.dot(xo, wo_ref[...], preferred_element_type=jnp.float32)
    out = (acc - mean * wsum_ref[...]) * rstd + b_ref[...]
    o_ref[...] = out.astype(o_ref.dtype)


def patch_merging(x, gamma, beta, w_reduction, *, target_block_rows=4096):
    """x: [B, H, W, C] -> [B, ceil(H/2), ceil(W/2), 2*C]

    gamma, beta: (4C,)    LayerNorm params
    w_reduction: (2C, 4C) torch nn.Linear weight (out_features, in_features)
    """
    B, H, W, C = x.shape
    # _patch_merging_pad: pad trailing spatial positions so H, W are even.
    if (H % 2) or (W % 2):
        x = jnp.pad(x, ((0, 0), (0, H % 2), (0, W % 2), (0, 0)))
    Hp, Wp = x.shape[1], x.shape[2]
    H2, W2 = Hp // 2, Wp // 2

    C2 = 2 * C       # fused channel width of one image row chunk: [w-even | w-odd]
    Co = 2 * C       # output features
    BH2 = B * H2
    N = BH2 * W2     # number of merged patches

    # x4[q, p, j, 0:C]  = x[b, 2i+p, 2j,   :]
    # x4[q, p, j, C:2C] = x[b, 2i+p, 2j+1, :]      (q = b*H2 + i)
    x4 = x.reshape(BH2, 2, W2, C2)

    # Lane-dense output: pad Co up to 128 with zero weight columns (sliced off
    # after the call).  Extra write bytes, but avoids masked partial stores.
    Co_pad = 128 if Co < 128 else Co

    mm_dtype = jnp.bfloat16 if x.dtype == jnp.bfloat16 else jnp.float32
    # TODO(synk): on v5e an f32 input could also use bf16 MXU operands (bf16-
    # native MXU); kept f32 here so f32 inputs match the reference to 1e-4.

    # Fold LayerNorm affine into the reduction weight, split its rows into the
    # even-row / odd-row halves (4C concat order is [x0, x1, x2, x3]), and
    # precompute the column sums for the mean fold + the folded bias.
    w_t = w_reduction.T.astype(jnp.float32)                       # (4C, Co)
    w_fold = gamma.astype(jnp.float32)[:, None] * w_t             # (4C, Co)
    bias = jnp.sum(beta.astype(jnp.float32)[:, None] * w_t, axis=0)   # (Co,)
    w_even = jnp.concatenate([w_fold[0:C], w_fold[2 * C:3 * C]], axis=0)   # rows of x0, x2
    w_odd = jnp.concatenate([w_fold[C:2 * C], w_fold[3 * C:4 * C]], axis=0)  # rows of x1, x3
    wsum = jnp.sum(w_even, axis=0) + jnp.sum(w_odd, axis=0)       # (Co,)

    if Co_pad != Co:
        w_even = jnp.pad(w_even, ((0, 0), (0, Co_pad - Co)))
        w_odd = jnp.pad(w_odd, ((0, 0), (0, Co_pad - Co)))
        bias = jnp.pad(bias, (0, Co_pad - Co))
        wsum = jnp.pad(wsum, (0, Co_pad - Co))
    w_even = w_even.astype(mm_dtype)
    w_odd = w_odd.astype(mm_dtype)
    bias = bias.reshape(1, Co_pad)
    wsum = wsum.reshape(1, Co_pad)

    # ---- Row-tile selection ------------------------------------------------
    # The output block is (tm, Co_pad) with tm = tr*W2; tm must be a multiple
    # of 8 unless it spans the whole array, so tr must be a multiple of
    # step_mult = 8 / gcd(W2, 8).
    step_mult = 8 // math.gcd(W2 if W2 > 0 else 8, 8)
    in_item = x.dtype.itemsize
    out_item = x.dtype.itemsize
    mm_item = jnp.dtype(mm_dtype).itemsize

    def _vmem_bytes(t):
        tm_ = t * W2
        in_blk = t * 2 * W2 * C2 * in_item        # one fused input block
        out_blk = tm_ * Co_pad * out_item
        streams = 2 * (in_blk + out_blk)          # double-buffered I/O blocks
        temps = (2 * tm_ * C2 + tm_ * Co_pad + 8 * tm_) * 4   # f32 stats/acc temps
        weights = 2 * C2 * Co_pad * mm_item + 2 * Co_pad * 4
        return streams + temps + weights

    budget = 20 * 2 ** 20   # fits v5e (limit raised below) / v6e / v7x-per-TC

    if BH2 < step_mult:
        tr = BH2            # tm == N: block spans the whole output -> legal
    else:
        tr = max(1, target_block_rows // max(W2, 1))
        # Keep >= ~8 grid steps where possible (pipelining + megacore on v7x).
        tr = min(tr, max(1, pl.cdiv(BH2, 8)))
        tr = min(tr, BH2)
        tr = max(step_mult, (tr // step_mult) * step_mult)
        while tr > step_mult and _vmem_bytes(tr) > budget:
            new_tr = max(step_mult, ((tr // 2) // step_mult) * step_mult)
            if new_tr == tr:
                break
            tr = new_tr
    tm = tr * W2

    grid = (pl.cdiv(BH2, tr),)

    out2d = pl.pallas_call(
        _patch_merging_kernel,
        out_shape=jax.ShapeDtypeStruct((N, Co_pad), x.dtype),
        grid_spec=pltpu.PrefetchScalarGridSpec(
            num_scalar_prefetch=0,
            grid=grid,
            in_specs=[
                # One contiguous block carrying both h-parities per step.
                pl.BlockSpec((tr, 2, W2, C2), lambda i: (i, 0, 0, 0)),
                pl.BlockSpec((C2, Co_pad), lambda i: (0, 0)),   # W_even (const)
                pl.BlockSpec((C2, Co_pad), lambda i: (0, 0)),   # W_odd  (const)
                pl.BlockSpec((1, Co_pad), lambda i: (0, 0)),    # colsum(W) fold
                pl.BlockSpec((1, Co_pad), lambda i: (0, 0)),    # folded bias
            ],
            out_specs=pl.BlockSpec((tm, Co_pad), lambda i: (i, 0)),
        ),
        compiler_params=pltpu.CompilerParams(
            dimension_semantics=("parallel",),
            vmem_limit_bytes=32 * 2 ** 20),   # raise v5e's 16 MiB default
    )(x4, w_even, w_odd, wsum, bias)

    if Co_pad != Co:
        out2d = out2d[:, :Co]
    return out2d.reshape(B, H2, W2, Co)


def patch_merging_reference(x, gamma, beta, w_reduction):
    """Pure-JAX reference mirroring the PyTorch forward."""
    B, H, W, C = x.shape
    x = jnp.pad(x, ((0, 0), (0, H % 2), (0, W % 2), (0, 0)))
    x0 = x[:, 0::2, 0::2, :]
    x1 = x[:, 1::2, 0::2, :]
    x2 = x[:, 0::2, 1::2, :]
    x3 = x[:, 1::2, 1::2, :]
    xm = jnp.concatenate([x0, x1, x2, x3], axis=-1).astype(jnp.float32)
    mean = jnp.mean(xm, axis=-1, keepdims=True)
    var = jnp.mean((xm - mean) ** 2, axis=-1, keepdims=True)
    xn = (xm - mean) * jax.lax.rsqrt(var + 1e-5)
    y = xn * gamma + beta
    return jnp.einsum("bhwk,ok->bhwo", y, w_reduction.astype(jnp.float32))


if __name__ == "__main__":
    key = jax.random.PRNGKey(0)

    def make_case(k, B, H, W, C):
        k_x, k_w, k_g, k_b = jax.random.split(k, 4)
        x = jax.random.normal(k_x, (B, H, W, C), dtype=jnp.float32)
        w = jax.random.normal(k_w, (2 * C, 4 * C), dtype=jnp.float32) * 0.05
        g = 1.0 + 0.1 * jax.random.normal(k_g, (4 * C,), dtype=jnp.float32)
        b = 0.1 * jax.random.normal(k_b, (4 * C,), dtype=jnp.float32)
        return x, g, b, w

    cases = [
        (2, 16, 16, 32),  # even spatial dims; Co=64 -> lane-padded output path
        (2, 15, 16, 32),  # odd H: exercises the padding path
        (1, 18, 16, 32),  # BH2 = 9 not divisible by the row tile: partial blocks
        (1, 16, 16, 64),  # Co = 128: lane-dense output without padding
    ]
    keys = jax.random.split(key, len(cases))
    for (B, H, W, C), k in zip(cases, keys):
        x, g, b, w = make_case(k, B, H, W, C)
        out = jax.block_until_ready(patch_merging(x, g, b, w))
        ref = patch_merging_reference(x, g, b, w)
        H2o, W2o = (H + H % 2) // 2, (W + W % 2) // 2
        assert out.shape == (B, H2o, W2o, 2 * C), (out.shape, (B, H2o, W2o, 2 * C))
        assert jnp.allclose(out, ref, atol=1e-4, rtol=1e-4), (
            f"mismatch vs reference for case {(B, H, W, C)}")

    print("KERNEL_OK")
</pallas_src>

<mosaic_0001>
module attributes {stable_mosaic.version = 11 : i64} {
  func.func @_patch_merging_kernel(%arg0: i32, %arg1: memref<2x2x8x64xf32, #tpu.memory_space<vmem>>, %arg2: memref<64x128xf32, #tpu.memory_space<vmem>>, %arg3: memref<64x128xf32, #tpu.memory_space<vmem>>, %arg4: memref<1x128xf32, #tpu.memory_space<vmem>>, %arg5: memref<1x128xf32, #tpu.memory_space<vmem>>, %arg6: memref<16x128xf32, #tpu.memory_space<vmem>>) attributes {dimension_semantics = [#tpu.dimension_semantics<parallel>], iteration_bounds = array<i64: 8>, scalar_prefetch = 0 : i64, scratch_operands = 0 : i64, tpu.core_type = #tpu.core_type<tc>, window_params = [{transform_indices = @transform_0, window_bounds = array<i64: 2, 2, 8, 64>}, {pipeline_mode = #tpu.pipeline_mode<synchronous>, transform_indices = @transform_1, window_bounds = array<i64: 64, 128>}, {pipeline_mode = #tpu.pipeline_mode<synchronous>, transform_indices = @transform_2, window_bounds = array<i64: 64, 128>}, {pipeline_mode = #tpu.pipeline_mode<synchronous>, transform_indices = @transform_3, window_bounds = array<i64: 1, 128>}, {pipeline_mode = #tpu.pipeline_mode<synchronous>, transform_indices = @transform_4, window_bounds = array<i64: 1, 128>}, {transform_indices = @transform_5, window_bounds = array<i64: 16, 128>}]} {
    %c0 = arith.constant 0 : index
    %c0_0 = arith.constant 0 : index
    %c0_1 = arith.constant 0 : index
    %c0_2 = arith.constant 0 : index
    %0 = vector.load %arg1[%c0, %c0_0, %c0_1, %c0_2] : memref<2x2x8x64xf32, #tpu.memory_space<vmem>>, vector<2x1x8x64xf32>
    %1 = vector.shape_cast %0 : vector<2x1x8x64xf32> to vector<2x8x64xf32>
    %2 = vector.shape_cast %1 : vector<2x8x64xf32> to vector<16x64xf32>
    %c0_3 = arith.constant 0 : index
    %c1 = arith.constant 1 : index
    %c0_4 = arith.constant 0 : index
    %c0_5 = arith.constant 0 : index
    %3 = vector.load %arg1[%c0_3, %c1, %c0_4, %c0_5] : memref<2x2x8x64xf32, #tpu.memory_space<vmem>>, vector<2x1x8x64xf32>
    %4 = vector.shape_cast %3 : vector<2x1x8x64xf32> to vector<2x8x64xf32>
    %5 = vector.shape_cast %4 : vector<2x8x64xf32> to vector<16x64xf32>
    %cst = arith.constant dense<0.000000e+00> : vector<16xf32>
    %6 = vector.multi_reduction <add>, %2, %cst [1] : vector<16x64xf32> to vector<16xf32>
    %7 = vector.shape_cast %6 : vector<16xf32> to vector<16x1xf32>
    %cst_6 = arith.constant dense<0.000000e+00> : vector<16xf32>
    %8 = vector.multi_reduction <add>, %5, %cst_6 [1] : vector<16x64xf32> to vector<16xf32>
    %9 = vector.shape_cast %8 : vector<16xf32> to vector<16x1xf32>
    %10 = arith.addf %7, %9 : vector<16x1xf32>
    %cst_7 = arith.constant 7.812500e-03 : f32
    %11 = vector.broadcast %cst_7 : f32 to vector<16x1xf32>
    %12 = arith.mulf %10, %11 : vector<16x1xf32>
    %13 = arith.mulf %2, %2 : vector<16x64xf32>
    %cst_8 = arith.constant dense<0.000000e+00> : vector<16xf32>
    %14 = vector.multi_reduction <add>, %13, %cst_8 [1] : vector<16x64xf32> to vector<16xf32>
    %15 = vector.shape_cast %14 : vector<16xf32> to vector<16x1xf32>
    %16 = arith.mulf %5, %5 : vector<16x64xf32>
    %cst_9 = arith.constant dense<0.000000e+00> : vector<16xf32>
    %17 = vector.multi_reduction <add>, %16, %cst_9 [1] : vector<16x64xf32> to vector<16xf32>
    %18 = vector.shape_cast %17 : vector<16xf32> to vector<16x1xf32>
    %19 = arith.addf %15, %18 : vector<16x1xf32>
    %cst_10 = arith.constant 7.812500e-03 : f32
    %20 = vector.broadcast %cst_10 : f32 to vector<16x1xf32>
    %21 = arith.mulf %19, %20 : vector<16x1xf32>
    %22 = arith.mulf %12, %12 : vector<16x1xf32>
    %23 = arith.subf %21, %22 : vector<16x1xf32>
    %cst_11 = arith.constant 0.000000e+00 : f32
    %24 = vector.broadcast %cst_11 : f32 to vector<16x1xf32>
    %25 = arith.maximumf %23, %24 : vector<16x1xf32>
    %cst_12 = arith.constant 9.99999974E-6 : f32
    %26 = vector.broadcast %cst_12 : f32 to vector<16x1xf32>
    %27 = arith.addf %25, %26 : vector<16x1xf32>
    %28 = math.rsqrt %27 : vector<16x1xf32>
    %c0_13 = arith.constant 0 : index
    %c0_14 = arith.constant 0 : index
    %29 = vector.load %arg2[%c0_13, %c0_14] : memref<64x128xf32, #tpu.memory_space<vmem>>, vector<64x128xf32>
    %cst_15 = arith.constant dense<0.000000e+00> : vector<16x128xf32>
    %30 = tpu.matmul %2, %29, %cst_15 {dimension_numbers = #tpu.dot_dimension_numbers<[1], [0], [0], [1], [0, 0, 1, 1], [], []>} : vector<16x64xf32>, vector<64x128xf32>, vector<16x128xf32> -> vector<16x128xf32>
    %c0_16 = arith.constant 0 : index
    %c0_17 = arith.constant 0 : index
    %31 = vector.load %arg3[%c0_16, %c0_17] : memref<64x128xf32, #tpu.memory_space<vmem>>, vector<64x128xf32>
    %cst_18 = arith.constant dense<0.000000e+00> : vector<16x128xf32>
    %32 = tpu.matmul %5, %31, %cst_18 {dimension_numbers = #tpu.dot_dimension_numbers<[1], [0], [0], [1], [0, 0, 1, 1], [], []>} : vector<16x64xf32>, vector<64x128xf32>, vector<16x128xf32> -> vector<16x128xf32>
    %33 = arith.addf %30, %32 : vector<16x128xf32>
    %c0_19 = arith.constant 0 : index
    %c0_20 = arith.constant 0 : index
    %34 = vector.load %arg4[%c0_19, %c0_20] : memref<1x128xf32, #tpu.memory_space<vmem>>, vector<1x128xf32>
    %35 = vector.broadcast %12 : vector<16x1xf32> to vector<16x128xf32>
    %36 = vector.broadcast %34 : vector<1x128xf32> to vector<16x128xf32>
    %37 = arith.mulf %35, %36 : vector<16x128xf32>
    %38 = arith.subf %33, %37 : vector<16x128xf32>
    %39 = vector.broadcast %28 : vector<16x1xf32> to vector<16x128xf32>
    %40 = arith.mulf %38, %39 : vector<16x128xf32>
    %c0_21 = arith.constant 0 : index
    %c0_22 = arith.constant 0 : index
    %41 = vector.load %arg5[%c0_21, %c0_22] : memref<1x128xf32, #tpu.memory_space<vmem>>, vector<1x128xf32>
    %42 = vector.broadcast %41 : vector<1x128xf32> to vector<16x128xf32>
    %43 = arith.addf %40, %42 : vector<16x128xf32>
    %c0_23 = arith.constant 0 : index
    %c0_24 = arith.constant 0 : index
    %44 = vector.load %arg6[%c0_23, %c0_24] : memref<16x128xf32, #tpu.memory_space<vmem>>, vector<16x128xf32>
    tpu.vector_store %arg6[%c0_23, %c0_24], %43 {strides = array<i32>} : memref<16x128xf32, #tpu.memory_space<vmem>>, vector<16x128xf32>,
    return
  }
  func.func @transform_0(%arg0: i32) -> (i32, i32, i32, i32) {
    %c0_i32 = arith.constant 0 : i32
    %c0_i32_0 = arith.constant 0 : i32
    %c0_i32_1 = arith.constant 0 : i32
    %c0_i32_2 = arith.constant 0 : i32
    return %arg0, %c0_i32, %c0_i32_0, %c0_i32_1 : i32, i32, i32, i32
  }
  func.func @transform_1(%arg0: i32) -> (i32, i32) {
    %c0_i32 = arith.constant 0 : i32
    %c0_i32_0 = arith.constant 0 : i32
    %c0_i32_1 = arith.constant 0 : i32
    return %c0_i32, %c0_i32_0 : i32, i32
  }
  func.func @transform_2(%arg0: i32) -> (i32, i32) {
    %c0_i32 = arith.constant 0 : i32
    %c0_i32_0 = arith.constant 0 : i32
    %c0_i32_1 = arith.constant 0 : i32
    return %c0_i32, %c0_i32_0 : i32, i32
  }
  func.func @transform_3(%arg0: i32) -> (i32, i32) {
    %c0_i32 = arith.constant 0 : i32
    %c0_i32_0 = arith.constant 0 : i32
    %c0_i32_1 = arith.constant 0 : i32
    return %c0_i32, %c0_i32_0 : i32, i32
  }
  func.func @transform_4(%arg0: i32) -> (i32, i32) {
    %c0_i32 = arith.constant 0 : i32
    %c0_i32_0 = arith.constant 0 : i32
    %c0_i32_1 = arith.constant 0 : i32
    return %c0_i32, %c0_i32_0 : i32, i32
  }
  func.func @transform_5(%arg0: i32) -> (i32, i32) {
    %c0_i32 = arith.constant 0 : i32
    %c0_i32_0 = arith.constant 0 : i32
    return %arg0, %c0_i32 : i32, i32
  }
}

</mosaic_0001>

<bundles_post_ra>
// kernel: tpu_custom_call.1
= control target key start
LH: loop header
LB: loop body
LE: loop exit
PB: predicated region body
PF: predicated region fallthrough
CT: control target
= control target key end

     0   :  { %10 = vsyncpa [#allocation3], 0  ;;  %s1055_s0 = inlined_call_operand.hbm [shape: f32[16,2,8,64], index: 0, kind: input, shape index: {}]   ;;  %s1056_s1 = inlined_call_operand.hbm [shape: f32[64,128], index: 1, kind: input, shape index: {}]   ;;  %s1057_s2 = inlined_call_operand.hbm [shape: f32[64,128], index: 2, kind: input, shape index: {}]   ;;  %s1058_s3 = inlined_call_operand.vmem [shape: f32[1,128], index: 3, kind: input, shape index: {}]   ;;  %s1059_s4 = inlined_call_operand.vmem [shape: f32[1,128], index: 4, kind: input, shape index: {}]   ;;  %s1060_s5 = inlined_call_operand.hbm [shape: f32[128,128], index: 5, kind: output, shape index: {}]  }
   0x1   :  { %12 = vsyncpa [#allocation3 + $0x1], 0 }
   0x2   :  { %13 = vsyncpa [#allocation6], 0 }
   0x3   :  { %14 = vsyncpa [#allocation4], 0 }
   0x4   :  { %16 = vsyncpa [#allocation4 + $0x1], 0  ;;  %s870_s18 = smov 0   ;;  %s872_s19 = smov 0  }
   0x5   :  { %s874_s20 = smov 0   ;;  %s876_s21 = smov 0  }
   0x6 LB: > { %s891_s22 = sadd.s32 4294967295, %s832_s21   ;;  %s551_s23 = sadd.s32 4294967294, %s832_s21   ;;  %s832_s21 = sphi %s876_s21, %s1071_s21   ;;  %s828_s20 = sphi %s874_s20, %s1070_s20   ;;  %s824_s19 = sphi %s872_s19, %s1069_s19   ;;  %s820_s18 = sphi %s870_s18, %s1068_s18  }
   0x7   : > { %p42_p0 = scmp.ne.s32.totalorder %s824_s19, %s820_s18  ;;  %p43_p1 = scmp.eq.s32.totalorder %s891_s22, 0 }
   0x8   : > { %p150_p2 = scmp.eq.s32.totalorder %s891_s22, 7  ;;  %p156_p3 = scmp.eq.s32.totalorder %s551_s23, 7 }
   0x9   : > { %p900_p4 = por %p43_p1, %p42_p0  ;;  %p552_p5 = scmp.ge.s32.totalorder %s832_s21, 1 }
   0xa   : > { %p905_p6 = por %p156_p3, %p42_p0  ;;  %p163_p7 = scmp.lt.s32.totalorder %s832_s21, 9 }
   0xb   : > { %s174_s28 = sshll.u32 %s1056_s1, 4  ;;  %s834_s30 = smov [#allocation5]   ;;  %s175_s28 = int_to_ptr.hbm [resolvable:$true] %s174_s28 }
   0xc   : > { %p913_p8 = pnand %p552_p5, %p163_p7  ;;  %s176_s6 = sshll.u32 %s834_s30, 4  ;;  %s177_s6 = int_to_ptr.vmem [resolvable:$true] %s176_s6 }
   0xd   : > { %s188_s9 = sshll.u32 %s1057_s2, 4  ;;  %s1061_s10 = smov 128   ;;  %s189_s9 = int_to_ptr.hbm [resolvable:$true] %s188_s9 }
   0xe   : > { %p607_p9 = pneg %p913_p8  ;;  %s836_s11 = smov 8  }
   0xf   : > { %s837_s12 = smov [#allocation7]   ;;  %s931_s14 = sadd.s32 1, %s832_s21  }
  0x10   : > { %p608_p10 = pnand %p607_p9, %p43_p1  ;;  %s190_s13 = sshll.u32 %s837_s12, 4  ;;  %s191_s13 = int_to_ptr.vmem [resolvable:$true] %s190_s13 }
  0x11   : > { %s29_s15 = sadd.s32 1, %s828_s20  ;;  %s26_s16 = ssub.s32 %s832_s21, %s931_s14 }
  0x12   : > { %610 = dma.hbm_to_vmem [thread:$0]  (!%p608_p10), %s175_s28, 1024, %s177_s6, [#allocation6], %s1061_s10, %s1061_s10, %s836_s11  }
  0x13   : > { %613 = dma.hbm_to_vmem [thread:$0]  (!%p608_p10), %s189_s9, 1024, %s191_s13, [#allocation6], %s1061_s10, %s1061_s10, %s836_s11  }
  0x14   : > { %p36_p11 = scmp.ne.s32.totalorder %s828_s20, %s824_s19  ;;  %p27_p12 = scmp.eq.s32.totalorder %s26_s16, 0 }
  0x15   : > { %p37_p13 = scmp.eq.s32.totalorder %s832_s21, 0  ;;  %p624_p3 = scmp.lt.s32.totalorder %s832_s21, 8 }
  0x16   : > { %p941_p0 = por %p150_p2, %p36_p11  ;;  %s210_s26 = sand.u32 1, %s828_s20  }
  0x17   : > { %s947_s23 = scalar_select %p27_p12, %s828_s20, %s29_s15  }
  0x18   : > { %p38_p5 = por %p37_p13, %p36_p11  ;;  %s556_s27 = sshll.u32 %s210_s26, 5 }
  0x19   : > { %s577_s28 = sshll.u32 %s832_s21, 5  ;;  %s214_s8 = scalar_lea.vmem [#allocation2], %s556_s27 }
  0x1a   : > { %s220_s7 = scalar_lea.hbm %s1055_s0, %s577_s28  ;;  %s223_s9 = sshll.u32 %s214_s8, 4  ;;  %s224_s9 = int_to_ptr.vmem [resolvable:$true] %s223_s9 }
  0x1b   : > { %s221_s12 = sshll.u32 %s220_s7, 4  ;;  %p954_p2 = pnand %p624_p3, %p38_p5  ;;  %s222_s12 = int_to_ptr.hbm [resolvable:$true] %s221_s12 }
  0x1c   : > { %s211_s15 = scalar_lea.sflag [#allocation3], %s210_s26  ;;  %s732_s16 = sshra.s32 %s222_s12, 4  ;;  %s733_s16 = int_to_ptr.hbm [resolvable:$true] %s732_s16 }
  0x1d   : > { %s734_s10 = scalar_lea.hbm %s733_s16, 32  ;;  %p736_p9 = pneg %p954_p2 }
  0x1e   : > { %p735_p7 = scmp.ne.s32.totalorder %s733_s16, %s734_s10  ;;  %s739_s30 = scalar_lea.hbm %s1055_s0, 256 }
  0x1f   : > { %p740_p12 = scmp.lt.s32.totalorder %s733_s16, %s1055_s0  ;;  %p741_p13 = scmp.lt.s32.totalorder %s739_s30, %s734_s10 }
  0x20   : > { %p737_p10 = pnand %p736_p9, %p735_p7 }
  0x21   : > { %p742_p3 = por %p741_p13, %p740_p12 }
  0x22   : > { %p738_p11 = pneg %p737_p10 }
  0x24   : > { %p743_p5 = pnand %p742_p3, %p738_p11 }
  0x26   : > { %746 = shalt.err (!%p743_p5)
}
  0x27   : > { %s1067_s26 = smov 128   ;;  %235 = sbr.rel (%p913_p8) target bundleno = 222 (0xde), region = 40 }
  0x28   : > { %617 = dma.hbm_to_vmem [thread:$0]  (!%p954_p2), %s222_s12, 512, %s224_s9, %s211_s15, %s1067_s26, %s1067_s26, %s836_s11  }
  0x29   : > { %s974_s8 = sand.u32 (!%p913_p8), 1, %s824_s19  }
  0x2a   : > { %s561_s16 = sshll.u32 (!%p913_p8), %s974_s8, 5  ;;  %s238_s10 = scalar_lea.sflag (!%p913_p8), [#allocation3], %s974_s8 }
  0x2b   : > { %s978_s28 = scalar_lea.vmem (!%p913_p8), [#allocation2], %s561_s16 }
  0x2c   : > { %807 = dma.done.wait (%p900_p4), %s238_s10, 512  }
  0x2d   : > { %809 = vsyncadd (%p900_p4), %s238_s10, 4294966784 }
  0x2e   : > { %811 = dma.done.wait (%p43_p1), [#allocation6], 2048  }
  0x2f   : > { %813 = vsyncadd (%p43_p1), [#allocation6], 4294965248  ;;  %vm286_vm0 = vcmask 523264   ;;  %v366_v0 = vld [vmem:[#allocation7 + $0x38] sm:$0xff]  ;;  %v989_v2 = vld [vmem:[%s978_s28 + $0x8] sm:$0xff]  ;;  %s564_s11 = sshll.u32 %s974_s8, 4 }
  0x30   : > { %v358_v1 = vld [vmem:[#allocation5 + $0x38] sm:$0xff]  ;;  %381 = vmatpush.msra.mxu0 %v366_v0  ;;  %579 = vmatpush.msra.mxu2 %v366_v0  ;;  %v293_v3 = vsel %vm286_vm0, %v989_v2, 0.0  ;;  %v994_v4 = vld [vmem:[%s978_s28] sm:$0xff]  ;;  %v365_v5 = vld [vmem:[#allocation7 + $0x30] sm:$0xff]  ;;  %v311_v28 = vmul.f32 %v989_v2, %v989_v2  ;;  %s578_s9 = sshll.u32 %s891_s22, 4  ;;  %s278_s22 = scalar_lea.vmem [#allocation8], %s564_s11 }
  0x31   : > { %410 = vmatpush.msra.mxu1 %v358_v1  ;;  %587 = vmatpush.msra.mxu3 %v358_v1  ;;  %v287_v6 = vsel %vm286_vm0, %v994_v4, 0.0  ;;  %v357_v7 = vld [vmem:[#allocation5 + $0x30] sm:$0xff]  ;;  %v364_v8 = vld [vmem:[#allocation7 + $0x28] sm:$0xff]  ;;  %v363_v10 = vld [vmem:[#allocation7 + $0x20] sm:$0xff]  ;;  %v303_v11 = vmul.f32 %v994_v4, %v994_v4  ;;  %s455_s15 = scalar_lea.hbm %s1060_s5, %s578_s9  ;;  %s456_s6 = sshll.u32 %s278_s22, 4  ;;  %s457_s6 = int_to_ptr.vmem [resolvable:$true] %s456_s6 }
  0x32   : > { %294 = vadd.xlane.f32.xlu1 %v293_v3  ;;  %288 = vadd.xlane.f32.xlu0 %v287_v6  ;;  %v356_v9 = vld [vmem:[#allocation5 + $0x28] sm:$0xff]  ;;  %v355_v12 = vld [vmem:[#allocation5 + $0x20] sm:$0xff]  ;;  %v566_v13 = vld [vmem:[%s978_s28 + $0x18] sm:$0xff]  ;;  %v313_v31 = vsel %vm286_vm0, %v311_v28, 0.0  ;;  %s458_s7 = sshll.u32 %s455_s15, 4  ;;  %s444_s26 = scalar_lea.sflag [#allocation4], %s974_s8  ;;  %s459_s7 = int_to_ptr.hbm [resolvable:$true] %s458_s7 }
  0x33   : > { %382 = vmatpush.msra.mxu0 %v365_v5  ;;  %580 = vmatpush.msra.mxu2 %v365_v5  ;;  %v362_v14 = vld [vmem:[#allocation7 + $0x18] sm:$0xff]  ;;  %v282_v15 = vld [vmem:[%s978_s28 + $0x10] sm:$0xff]  ;;  %v296_v17 = vsel %vm286_vm0, %v566_v13, 0.0  ;;  %v305_v18 = vsel %vm286_vm0, %v303_v11, 0.0  ;;  %v360_v22 = vld [vmem:[#allocation7 + $0x8] sm:$0xff]  ;;  %v312_v25 = vmul.f32 %v566_v13, %v566_v13  ;;  %s776_s16 = sshra.s32 %s459_s7, 4  ;;  %s777_s16 = int_to_ptr.hbm [resolvable:$true] %s776_s16 }
  0x34   : > { %411 = vmatpush.msra.mxu1 %v357_v7  ;;  %588 = vmatpush.msra.mxu3 %v357_v7  ;;  %v354_v16 = vld [vmem:[#allocation5 + $0x18] sm:$0xff]  ;;  %v290_v19 = vsel %vm286_vm0, %v282_v15, 0.0  ;;  %v361_v20 = vld [vmem:[#allocation7 + $0x10] sm:$0xff]  ;;  %v352_v23 = vld [vmem:[#allocation5 + $0x8] sm:$0xff]  ;;  %v304_v27 = vmul.f32 %v282_v15, %v282_v15  ;;  %s778_s10 = scalar_lea.hbm %s777_s16, 16  ;;  %s782_s29 = scalar_lea.hbm %s1060_s5, 128 }
  0x35   : > { %383 = vmatpush.msra.mxu0 %v364_v8  ;;  %581 = vmatpush.msra.mxu2 %v364_v8  ;;  %v353_v21 = vld [vmem:[#allocation5 + $0x10] sm:$0xff]  ;;  %v359_v24 = vld [vmem:[#allocation7] sm:$0xff]  ;;  %v316_v29 = vsel %vm286_vm0, %v312_v25, 0.0  ;;  %p779_p1 = scmp.ne.s32.totalorder %s777_s16, %s778_s10  ;;  %p783_p2 = scmp.lt.s32.totalorder %s777_s16, %s1060_s5 }
  0x36   : > { %412 = vmatpush.msra.mxu1 %v356_v9  ;;  %589 = vmatpush.msra.mxu3 %v356_v9  ;;  %v351_v26 = vld [vmem:[#allocation5] sm:$0xff]  ;;  %v308_v30 = vsel %vm286_vm0, %v304_v27, 0.0  ;;  %p784_p7 = scmp.lt.s32.totalorder %s782_s29, %s778_s10 }
  0x37   : > { %384 = vmatpush.msra.mxu0 %v363_v10  ;;  %582 = vmatpush.msra.mxu2 %v363_v10  ;;  %p780_p4 = pnand %p779_p1, %p941_p0 }
  0x38   : > { %413 = vmatpush.msra.mxu1 %v355_v12  ;;  %590 = vmatpush.msra.mxu3 %v355_v12  ;;  %p785_p9 = por %p784_p7, %p783_p2 }
  0x39   : > { %385 = vmatpush.msra.mxu0 %v362_v14  ;;  %583 = vmatpush.msra.mxu2 %v362_v14  ;;  %p781_p8 = pneg %p780_p4 }
  0x3a   : > { %414 = vmatpush.msra.mxu1 %v354_v16  ;;  %591 = vmatpush.msra.mxu3 %v354_v16 }
  0x3b   : > { %297 = vadd.xlane.f32.xlu1 %v296_v17  ;;  %306 = vadd.xlane.f32.xlu2 %v305_v18  ;;  %p786_p10 = pnand %p785_p9, %p781_p8 }
  0x3c   : > { %291 = vadd.xlane.f32.xlu0 %v290_v19  ;;  %386 = vmatpush.msra.mxu0 %v361_v20 }
  0x3d   : > { %584 = vmatpush.msra.mxu2 %v361_v20  ;;  %415 = vmatpush.msra.mxu1 %v353_v21 }
  0x3e   : > { %592 = vmatpush.msra.mxu3 %v353_v21  ;;  %387 = vmatpush.msra.mxu0 %v360_v22 }
  0x3f   : > { %585 = vmatpush.msra.mxu2 %v360_v22  ;;  %416 = vmatpush.msra.mxu1 %v352_v23 }
  0x40   : > { %593 = vmatpush.msra.mxu3 %v352_v23  ;;  %388 = vmatpush.msra.mxu0 %v359_v24 }
  0x41   : > { %586 = vmatpush.msra.mxu2 %v359_v24  ;;  %417 = vmatpush.msra.mxu1 %v351_v26 }
  0x42   : > { %594 = vmatpush.msra.mxu3 %v351_v26  ;;  %567 = vmatmul.msk.f32.vlgmr.msra.gmra.mxu0 %vm286_vm0, %v989_v2  ;;  %v666_v2 = vld [vmem:[%s1058_s3] ss:$0 sm:$0xff] }
  0x43   : > { %568 = vmatmul.msk.f32.vlgmr.msra.gmra.mxu2 %vm286_vm0, %v566_v13  ;;  %569 = vmatmul.msk.f32.vlgmr.msra.gmra.mxu1 %vm286_vm0, %v994_v4  ;;  %v667_v13 = vld [vmem:[%s1059_s4] ss:$0 sm:$0xff] }
  0x44   : > { %570 = vmatmul.msk.f32.vlgmr.msra.gmra.mxu3 %vm286_vm0, %v282_v15  ;;  %317 = vadd.xlane.f32.xlu1 %v316_v29 }
  0x45   : > { %309 = vadd.xlane.f32.xlu2 %v308_v30  ;;  %314 = vadd.xlane.f32.xlu0 %v313_v31 }
  0xa5   : > { %v295_v32 = vpop.xlane.xlu1 %294  ;;  %v289_v33 = vpop.xlane.xlu0 %288 }
  0xa6   : > { %v299_v37 = vadd.f32 %v295_v32, %v289_v33 }
  0xa8   : > { %v301_v39 = vmul.f32 0.0078125, %v299_v37 }
  0xaa   : > { %v323_v46 = vmul.f32 %v301_v39, %v301_v39  ;;  %v429_v10 = vmul.f32 %v666_v2, %v301_v39 }
  0xae   : > { %v298_v34 = vpop.xlane.xlu1 %297  ;;  %v307_v35 = vpop.xlane.xlu2 %306 }
  0xaf   : > { %v292_v36 = vpop.xlane.xlu0 %291 }
  0xb0   : > { %v300_v38 = vadd.f32 %v298_v34, %v292_v36 }
  0xb2   : > { %v302_v40 = vmul.f32 0.0078125, %v300_v38 }
  0xb4   : > { %v324_v47 = vmul.f32 %v302_v40, %v302_v40  ;;  %v430_v8 = vmul.f32 %v666_v2, %v302_v40 }
  0xb7   : > { %v318_v41 = vpop.xlane.xlu1 %317 }
  0xb8   : > { %v310_v42 = vpop.xlane.xlu2 %309  ;;  %v315_v43 = vpop.xlane.xlu0 %314 }
  0xb9   : > { %v320_v44 = vadd.f32 %v318_v41, %v310_v42  ;;  %v319_v45 = vadd.f32 %v315_v43, %v307_v35 }
  0xbb   : > { %v322_v48 = vmul.f32 0.0078125, %v320_v44  ;;  %v321_v49 = vmul.f32 0.0078125, %v319_v45 }
  0xbd   : > { %v326_v50 = vsub.f32 %v322_v48, %v324_v47  ;;  %v325_v51 = vsub.f32 %v321_v49, %v323_v46 }
  0xbf   : > { %v328_v52 = vmax.f32 %v326_v50, 0.0  ;;  %v327_v53 = vmax.f32 %v325_v51, 0.0  ;;  %v390_v0 = vpop.f32.mrf.mxu0 }
  0xc0   : > { %v419_v1 = vpop.f32.mrf.mxu1 }
  0xc1   : > { %v330_v54 = vadd.f32 1e-05, %v328_v52  ;;  %v329_v55 = vadd.f32 1e-05, %v327_v53  ;;  %v420_v7 = vadd.f32 %v419_v1, %v390_v0 }
  0xc3   : > { %668 = vrsqrt.f32 %v330_v54  ;;  %vm347_vm3 = vweird.f32 %v330_v54  ;;  %vm337_vm4 = vweird.f32 %v329_v55  ;;  %v431_v15 = vsub.f32 %v420_v7, %v429_v10 }
  0xc4   : > { %670 = vrsqrt.f32 %v329_v55 }
  0xc6   : > { %v393_v61 = vpop.f32.mrf.mxu2 }
  0xc7   : > { %v422_v62 = vpop.f32.mrf.mxu3 }
  0xc8   : > { %v423_v5 = vadd.f32 %v422_v62, %v393_v61 }
  0xc9   : > { %v669_v56 = vpop.eup %668 }
  0xca   : > { %v671_v57 = vpop.eup %670  ;;  %v342_v58 = vmul.f32 %v669_v56, %v330_v54  ;;  %vm348_vm1 = vweird.f32 %v669_v56  ;;  %v432_v14 = vsub.f32 %v423_v5, %v430_v8 }
  0xcb   : > { %v332_v59 = vmul.f32 %v671_v57, %v329_v55  ;;  %vm338_vm2 = vweird.f32 %v671_v57  ;;  %vm349_vm5 = vmor %vm347_vm3, %vm348_vm1 }
  0xcc   : > { %v343_v60 = vmul.f32 %v669_v56, %v342_v58  ;;  %vm339_vm6 = vmor %vm337_vm4, %vm338_vm2 }
  0xcd   : > { %v333_v63 = vmul.f32 %v671_v57, %v332_v59 }
  0xce   : > { %v344_v3 = vmul.f32 0.5, %v343_v60 }
  0xcf   : > { %v334_v4 = vmul.f32 0.5, %v333_v63 }
  0xd0   : > { %v345_v6 = vsub.f32 1.5, %v344_v3 }
  0xd1   : > { %v335_v9 = vsub.f32 1.5, %v334_v4 }
  0xd2   : > { %v346_v11 = vmul.f32 %v669_v56, %v345_v6 }
  0xd3   : > { %v336_v12 = vmul.f32 %v671_v57, %v335_v9 }
  0xd4   : > { %v350_v16 = vsel %vm349_vm5, %v669_v56, %v346_v11 }
  0xd5   : > { %v340_v17 = vsel %vm339_vm6, %v671_v57, %v336_v12  ;;  %v434_v18 = vmul.f32 %v432_v14, %v350_v16 }
  0xd6   : > { %v433_v19 = vmul.f32 %v431_v15, %v340_v17 }
  0xd7   : > { %v440_v20 = vadd.f32 %v667_v13, %v434_v18 }
  0xd8   : > { %v439_v21 = vadd.f32 %v667_v13, %v433_v19 }
  0xd9   : > { %442 = vst [vmem:[%s278_s22 + $0x8] sm:$0xff] %v440_v20 }
  0xda   : > { %441 = vst [vmem:[%s278_s22] sm:$0xff] %v439_v21 }
  0xdb   : > { %789 = shalt.err (!%p786_p10)
}
  0xdc   : > { %s838_s8 = smov 128   ;;  %s839_s12 = smov 8  }
  0xdd   : > { %605 = dma.vmem_to_hbm [thread:$0]  (%p941_p0), %s457_s6, 256, %s459_s7, %s444_s26, %s838_s8, %s838_s8, %s839_s12  }
  0xde PF: > { %p627_p11 = scmp.ge.s32.totalorder %s832_s21, 2  ;;  %s473_s13 = sand.u32 1, %s820_s18  }
  0xdf   : > { %s474_s15 = scalar_lea.sflag [#allocation4], %s473_s13 }
  0xe0   : > { %p619_p12 = pnand %p627_p11, %p905_p6 }
  0xe2   : > { %p620_p13 = pneg %p619_p12 }
  0xe4   : > { %815 = dma.done.wait (%p620_p13), %s474_s15, 256  }
  0xe5   : > { %817 = vsyncadd (%p620_p13), %s474_s15, 4294967040  ;;  %p19_p3 = scmp.ge.s32.totalorder %s931_s14, 10   ;;  %s1068_s18 = smov %s824_s19 }
  0xe6   : > { %s1069_s19 = smov %s828_s20  ;;  %s1070_s20 = smov %s947_s23 }
  0xe7   : > { %s1071_s21 = smov %s931_s14  ;;  %21 = sbr.rel (!%p19_p3) target bundleno = 6 (0x6), region = 94 }
  0xec   :  { %480 = vsyncpa [#allocation3], 1 }
  0xed   :  { %482 = vsyncpa [#allocation3 + $0x1], 1 }
  0xee   :  { %483 = vsyncpa [#allocation6], 1 }
  0xef   :  { %484 = vsyncpa [#allocation4], 1 }
  0xf0   :  { %486 = vsyncpa [#allocation4 + $0x1], 1 }

</bundles_post_ra>
